<compile_context>
chip_gen: v7x
topology: tpu7x:2x2x1
jax: 0.10.0
libtpu: 0.0.40
codegen_flags: <defaults>
</compile_context>

<pallas_src>
import functools
import math

import jax
import jax.numpy as jnp
from jax import lax
from jax.experimental import pallas as pl
from jax.experimental.pallas import tpu as pltpu

_VMEM_LIMIT = 32 * 1024 * 1024


# --------------------------------------------------------------------------
# small helpers
# --------------------------------------------------------------------------
def _round_up(x, m):
    return (x + m - 1) // m * m


def _pad_rows(a, target_rows):
    if a.shape[0] == target_rows:
        return a
    pad = target_rows - a.shape[0]
    return jnp.pad(a, ((0, pad),) + ((0, 0),) * (a.ndim - 1))


# --------------------------------------------------------------------------
# Pallas kernels
# --------------------------------------------------------------------------
def _mm_kernel(*refs, relu, has_res):
    # p_ref: (TM, KB) bf16, w_ref: (KB, TN) bf16, b_ref: (1, TN) f32,
    # [r_ref: (TM, TN)], o_ref: (TM, TN)
    if has_res:
        p_ref, w_ref, b_ref, r_ref, o_ref = refs
    else:
        p_ref, w_ref, b_ref, o_ref = refs
    acc = jnp.dot(p_ref[...], w_ref[...], preferred_element_type=jnp.float32)
    acc = acc + b_ref[...]                      # BN scale folded into weights; bias only
    if has_res:
        acc = acc + r_ref[...].astype(jnp.float32)
    if relu:
        acc = jnp.maximum(acc, 0.0)
    o_ref[...] = acc.astype(o_ref.dtype)


def _max9_kernel(t_ref, o_ref):
    # t_ref: (9, TM, C) — channels on lanes; pure VPU max chain over the 9 taps.
    acc = t_ref[0].astype(jnp.float32)
    for i in range(1, 9):
        acc = jnp.maximum(acc, t_ref[i].astype(jnp.float32))
    o_ref[...] = acc.astype(o_ref.dtype)


def _gap_kernel(x_ref, o_ref):
    # x_ref: (TB, HW, C) -> mean over HW -> (TB, C)
    o_ref[...] = jnp.mean(x_ref[...].astype(jnp.float32), axis=1)


# --------------------------------------------------------------------------
# Pallas-backed ops (wrappers)
# --------------------------------------------------------------------------
def matmul_epilogue(p, w, b, *, relu, residual=None, out_dtype=jnp.bfloat16):
    """Lane-dense matmul + bias (+residual, +ReLU) epilogue.

    p: (M, K) bf16 patches / activations.
    w: 2-D (K, Cout) bf16 for dense convs / linears, OR
       3-D (SG, Kp, TNg) bf16 block-diagonal packed grouped weights (K == SG*Kp,
       Cout == SG*TNg; super-group n reads K-slab n of the patches).
    b: (1, Cout) f32.  residual: (M, Cout) or None.
    """
    M, K = p.shape
    TM = min(512, _round_up(M, 8))
    M_pad = _round_up(M, TM)
    p = _pad_rows(p, M_pad)

    if w.ndim == 3:
        SG, Kp, TN = w.shape
        assert K == SG * Kp
        Cout = SG * TN
        n_tiles = SG
        p_spec = pl.BlockSpec((TM, Kp), lambda m, n: (m, n))
        w_spec = pl.BlockSpec((None, Kp, TN), lambda m, n: (n, 0, 0))
    else:
        Cout = w.shape[1]
        TN = Cout
        for cand in (512, 256, 128):
            if Cout % cand == 0:
                TN = cand
                break
        n_tiles = Cout // TN
        p_spec = pl.BlockSpec((TM, K), lambda m, n: (m, 0))
        w_spec = pl.BlockSpec((K, TN), lambda m, n: (0, n))

    inputs = [p, w, b]
    in_specs = [p_spec, w_spec, pl.BlockSpec((1, TN), lambda m, n: (0, n))]
    has_res = residual is not None
    if has_res:
        inputs.append(_pad_rows(residual, M_pad))
        in_specs.append(pl.BlockSpec((TM, TN), lambda m, n: (m, n)))

    out = pl.pallas_call(
        functools.partial(_mm_kernel, relu=relu, has_res=has_res),
        out_shape=jax.ShapeDtypeStruct((M_pad, Cout), out_dtype),
        grid=(M_pad // TM, n_tiles),
        in_specs=in_specs,
        out_specs=pl.BlockSpec((TM, TN), lambda m, n: (m, n)),
        compiler_params=pltpu.CompilerParams(
            dimension_semantics=("parallel", "parallel"),
            vmem_limit_bytes=_VMEM_LIMIT,
        ),
    )(*inputs)
    return out[:M]


@functools.partial(jax.jit, static_argnames=("kh", "kw", "stride", "padding", "relu"))
def conv_bn_act(x, w, b, residual=None, *, kh, kw, stride, padding, relu):
    """Conv + folded-BN bias (+fused residual, +ReLU).  x: (N,H,W,Cin) bf16 NHWC.

    w is pre-packed (see make_params): 2-D (Cin*KH*KW, Cout) for dense convs, or
    3-D (SG, Kp, 128) block-diagonal for the grouped 3x3 convs.
    """
    N, H, W, Cin = x.shape
    if kh == 1 and kw == 1:
        # 1x1 conv: no im2col.  Stride handled by spatial subsampling.
        xs = x[:, ::stride, ::stride, :] if stride > 1 else x
        _, Ho, Wo, _ = xs.shape
        p = xs.reshape(N * Ho * Wo, Cin)
    else:
        # TODO(synk): im2col patch extraction stays in XLA; a halo-exchange Pallas
        # conv would avoid the 9x patch expansion but is out of scope here.
        patches = lax.conv_general_dilated_patches(
            x,
            filter_shape=(kh, kw),
            window_strides=(stride, stride),
            padding=((padding, padding), (padding, padding)),
            dimension_numbers=("NHWC", "HWIO", "NHWC"),
        )  # feature order (Cin, KH, KW) — channel-major, matches packed weights.
        _, Ho, Wo, KF = patches.shape
        p = patches.reshape(N * Ho * Wo, KF)
    p = p.astype(jnp.bfloat16)

    res2d = None
    if residual is not None:
        res2d = residual.reshape(N * Ho * Wo, -1)

    out = matmul_epilogue(p, w, b, relu=relu, residual=res2d,
                          out_dtype=jnp.bfloat16)
    return out.reshape(N, Ho, Wo, out.shape[-1])


@jax.jit
def maxpool_3x3_s2(x):
    """MaxPool2d(kernel=3, stride=2, padding=1).  Input is post-ReLU (>= 0) so zero
    padding is exactly equivalent to -inf padding."""
    N, H, W, C = x.shape
    Ho = (H - 1) // 2 + 1
    Wo = (W - 1) // 2 + 1
    xp = jnp.pad(x, ((0, 0), (1, 1), (1, 1), (0, 0)))
    taps = [
        xp[:, khi:khi + 2 * Ho - 1:2, kwi:kwi + 2 * Wo - 1:2, :]
        for khi in range(3) for kwi in range(3)
    ]
    M = N * Ho * Wo
    t = jnp.stack(taps, axis=0).reshape(9, M, C)          # channels on lanes
    TM = min(512, _round_up(M, 8))
    M_pad = _round_up(M, TM)
    if M_pad != M:
        t = jnp.pad(t, ((0, 0), (0, M_pad - M), (0, 0)))
    out = pl.pallas_call(
        _max9_kernel,
        out_shape=jax.ShapeDtypeStruct((M_pad, C), x.dtype),
        grid=(M_pad // TM,),
        in_specs=[pl.BlockSpec((9, TM, C), lambda i: (0, i, 0))],
        out_specs=pl.BlockSpec((TM, C), lambda i: (i, 0)),
        compiler_params=pltpu.CompilerParams(
            dimension_semantics=("parallel",), vmem_limit_bytes=_VMEM_LIMIT
        ),
    )(t)
    return out[:M].reshape(N, Ho, Wo, C)


@jax.jit
def global_avg_pool(x):
    """Adaptive avg pool to 1x1: mean over H,W.  x: (N,H,W,C) -> (N,C) f32."""
    N, H, W, C = x.shape
    HW = H * W
    xr = x.reshape(N, HW, C)
    TB = 8
    N_pad = _round_up(N, TB)
    xr = _pad_rows(xr, N_pad)
    out = pl.pallas_call(
        _gap_kernel,
        out_shape=jax.ShapeDtypeStruct((N_pad, C), jnp.float32),
        grid=(N_pad // TB,),
        in_specs=[pl.BlockSpec((TB, HW, C), lambda i: (i, 0, 0))],
        out_specs=pl.BlockSpec((TB, C), lambda i: (i, 0)),
        compiler_params=pltpu.CompilerParams(
            dimension_semantics=("parallel",), vmem_limit_bytes=_VMEM_LIMIT
        ),
    )(xr)
    return out[:N]


@functools.partial(jax.jit, static_argnames=("out_dtype",))
def dense_bias(x, w, b, out_dtype=jnp.float32):
    """x: (M,K), w: (K,N) bf16, b: (1,N) f32 -> x @ w + b."""
    return matmul_epilogue(x.astype(jnp.bfloat16), w, b, relu=False,
                           residual=None, out_dtype=out_dtype)


# --------------------------------------------------------------------------
# Deterministic parameter construction (ResNeXt-50 32x4d shapes), pre-packed:
#   * BN scale folded into weights, bias kept separately as (1, Cout) f32.
#   * dense conv weights stored as (Cin*KH*KW, Cout) bf16.
#   * grouped 3x3 conv weights stored as (SG, Kp, 128) block-diagonal bf16.
#   * fc lane-padded to 1024 outputs; the 3 heads fused into one (1024, 128) matmul.
# --------------------------------------------------------------------------
def _make_conv_w(key, cout, cin_g, kh, kw):
    fan_in = cin_g * kh * kw
    return jax.random.normal(key, (cout, cin_g, kh, kw), jnp.float32) * math.sqrt(
        2.0 / fan_in
    )


def _bn_fold(c, eps=1e-5):
    # inference BN with gamma=1, beta=0, running_mean=0, running_var=1.
    gamma = jnp.ones((c,), jnp.float32)
    beta = jnp.zeros((c,), jnp.float32)
    mean = jnp.zeros((c,), jnp.float32)
    var = jnp.ones((c,), jnp.float32)
    scale = gamma / jnp.sqrt(var + eps)
    bias = beta - mean * scale
    return scale, bias


def _prep_dense(w_pt, scale, bias):
    cout = w_pt.shape[0]
    w2d = (w_pt.reshape(cout, -1).T * scale[None, :]).astype(jnp.bfloat16)
    return w2d, bias.reshape(1, cout)


def _prep_grouped(w_pt, scale, groups, pack_to=128):
    """Pack a grouped conv weight (Cout, Cin/g, KH, KW) into (SG, Kp, pack_to)
    block-diagonal bf16 tiles with BN scale folded in (vectorized, no host loop)."""
    cout, cin_g, kh, kw = w_pt.shape
    cg = cout // groups
    kg = cin_g * kh * kw
    gp = max(1, min(pack_to // cg, groups))       # groups fused per super-group
    assert groups % gp == 0
    sg = groups // gp
    w = w_pt.reshape(groups, cg, kg).transpose(0, 2, 1)           # (G, Kg, Cg)
    w = w * scale.reshape(groups, 1, cg)                          # fold BN scale
    w = w.reshape(sg, gp, kg, cg)
    eye = jnp.eye(gp, dtype=w.dtype)
    bd = w[:, :, :, None, :] * eye[None, :, None, :, None]        # (SG,gp,Kg,gp,Cg)
    bd = bd.reshape(sg, gp * kg, gp * cg)                         # (SG, Kp, 128)
    return bd.astype(jnp.bfloat16)


def _make_bottleneck(key, inplanes, planes, stride, groups=32, base_width=4):
    width = int(planes * (base_width / 64.0)) * groups
    k = jax.random.split(key, 4)
    s1, b1 = _bn_fold(width)
    s2, b2 = _bn_fold(width)
    s3, b3 = _bn_fold(planes * 4)
    w1, bb1 = _prep_dense(_make_conv_w(k[0], width, inplanes, 1, 1), s1, b1)
    w2 = _prep_grouped(_make_conv_w(k[1], width, width // groups, 3, 3), s2, groups)
    w3, bb3 = _prep_dense(_make_conv_w(k[2], planes * 4, width, 1, 1), s3, b3)
    p = {
        "conv1_w": w1, "conv1_b": bb1,
        "conv2_w": w2, "conv2_b": b2.reshape(1, width),
        "conv3_w": w3, "conv3_b": bb3,
        "stride": stride,
    }
    if stride != 1 or inplanes != planes * 4:
        sd, bd = _bn_fold(planes * 4)
        wd, bbd = _prep_dense(_make_conv_w(k[3], planes * 4, inplanes, 1, 1), sd, bd)
        p["down_w"] = wd
        p["down_b"] = bbd
    return p


def make_params(key):
    keys = jax.random.split(key, 8)
    s0, b0 = _bn_fold(64)
    w0, bb0 = _prep_dense(_make_conv_w(keys[0], 64, 3, 7, 7), s0, b0)
    params = {"conv1_w": w0, "conv1_b": bb0}

    inplanes = 64
    stage_cfg = [(64, 3, 1), (128, 4, 2), (256, 6, 2), (512, 3, 2)]
    stage_keys = jax.random.split(keys[1], 4)
    for si, (planes, nblocks, stride) in enumerate(stage_cfg):
        bkeys = jax.random.split(stage_keys[si], nblocks)
        blocks = []
        for bi in range(nblocks):
            s = stride if bi == 0 else 1
            blocks.append(_make_bottleneck(bkeys[bi], inplanes, planes, s))
            inplanes = planes * 4
        params[f"layer{si + 1}"] = blocks

    def lin(k, fin, fout):
        w = jax.random.normal(k, (fin, fout), jnp.float32) * (1.0 / math.sqrt(fin))
        b = jnp.zeros((fout,), jnp.float32)
        return w, b

    # backbone.fc, lane-padded 1000 -> 1024 outputs (extra columns are zero, inert).
    fc_w, fc_b = lin(keys[2], 2048, 1000)
    fc_w_pad = jnp.zeros((2048, 1024), jnp.float32).at[:, :1000].set(fc_w)
    fc_b_pad = jnp.zeros((1, 1024), jnp.float32).at[0, :1000].set(fc_b)
    params["fc_w"] = fc_w_pad.astype(jnp.bfloat16)
    params["fc_b"] = fc_b_pad

    # The three heads fused into one lane-dense (1024, 128) matmul:
    # columns [0:3] mask, [3:5] gender, [5:8] age, rest zero-padding.
    # Rows 1000..1023 are zero so the fc padding columns never contribute.
    mask_w, mask_b = lin(keys[3], 1000, 3)
    gender_w, gender_b = lin(keys[4], 1000, 2)
    age_w, age_b = lin(keys[5], 1000, 3)
    hw = jnp.zeros((1024, 128), jnp.float32)
    hw = hw.at[:1000, 0:3].set(mask_w).at[:1000, 3:5].set(gender_w)
    hw = hw.at[:1000, 5:8].set(age_w)
    hb = jnp.zeros((1, 128), jnp.float32)
    hb = hb.at[0, 0:3].set(mask_b).at[0, 3:5].set(gender_b).at[0, 5:8].set(age_b)
    params["heads_w"] = hw.astype(jnp.bfloat16)
    params["heads_b"] = hb
    return params


# --------------------------------------------------------------------------
# Forward pass
# --------------------------------------------------------------------------
def _bottleneck_forward(x, p):
    stride = p["stride"]
    if "down_w" in p:
        identity = conv_bn_act(x, p["down_w"], p["down_b"],
                               kh=1, kw=1, stride=stride, padding=0, relu=False)
    else:
        identity = x
    out = conv_bn_act(x, p["conv1_w"], p["conv1_b"],
                      kh=1, kw=1, stride=1, padding=0, relu=True)
    out = conv_bn_act(out, p["conv2_w"], p["conv2_b"],
                      kh=3, kw=3, stride=stride, padding=1, relu=True)
    # conv3 with the residual add + final ReLU fused into the matmul epilogue.
    out = conv_bn_act(out, p["conv3_w"], p["conv3_b"], identity,
                      kh=1, kw=1, stride=1, padding=0, relu=True)
    return out


def my_multi_resnext_forward(x_nchw, params):
    """Returns (mask_logits, gender_logits, age_logits) = PyTorch's (x, y, z)."""
    x = jnp.transpose(x_nchw, (0, 2, 3, 1)).astype(jnp.bfloat16)   # NCHW -> NHWC
    x = conv_bn_act(x, params["conv1_w"], params["conv1_b"],
                    kh=7, kw=7, stride=2, padding=3, relu=True)
    x = maxpool_3x3_s2(x)
    for layer in ("layer1", "layer2", "layer3", "layer4"):
        for blk in params[layer]:
            x = _bottleneck_forward(x, blk)
    feat = global_avg_pool(x)                                      # (N, 2048) f32
    feat = dense_bias(feat, params["fc_w"], params["fc_b"],
                      out_dtype=jnp.bfloat16)                      # (N, 1024)
    heads = dense_bias(feat, params["heads_w"], params["heads_b"],
                       out_dtype=jnp.float32)                      # (N, 128)
    mask = heads[:, 0:3]
    gender = heads[:, 3:5]
    age = heads[:, 5:8]
    return mask, gender, age


# --------------------------------------------------------------------------
if __name__ == "__main__":
    key = jax.random.PRNGKey(0)
    pkey, xkey = jax.random.split(key)
    params = make_params(pkey)
    x = jax.random.normal(xkey, (2, 3, 64, 64), jnp.float32)       # NCHW like PyTorch
    mask, gender, age = my_multi_resnext_forward(x, params)
    (mask, gender, age) = jax.block_until_ready((mask, gender, age))
    assert mask.shape == (2, 3) and gender.shape == (2, 2) and age.shape == (2, 3)
    assert jnp.all(jnp.isfinite(mask)) and jnp.all(jnp.isfinite(gender)) and jnp.all(
        jnp.isfinite(age)
    )
    print("KERNEL_OK")
</pallas_src>

<mosaic_0001>
module attributes {stable_mosaic.version = 11 : i64} {
  func.func @_mm_kernel(%arg0: i32, %arg1: i32, %arg2: memref<512x147xbf16, #tpu.memory_space<vmem>>, %arg3: memref<147x64xbf16, #tpu.memory_space<vmem>>, %arg4: memref<1x64xf32, #tpu.memory_space<vmem>>, %arg5: memref<512x64xbf16, #tpu.memory_space<vmem>>) attributes {dimension_semantics = [#tpu.dimension_semantics<parallel>, #tpu.dimension_semantics<parallel>], iteration_bounds = array<i64: 4, 1>, scalar_prefetch = 0 : i64, scratch_operands = 0 : i64, tpu.core_type = #tpu.core_type<tc>, window_params = [{transform_indices = @transform_0, window_bounds = array<i64: 512, 147>}, {transform_indices = @transform_1, window_bounds = array<i64: 147, 64>}, {transform_indices = @transform_2, window_bounds = array<i64: 1, 64>}, {transform_indices = @transform_3, window_bounds = array<i64: 512, 64>}]} {
    %c0 = arith.constant 0 : index
    %c0_0 = arith.constant 0 : index
    %0 = vector.load %arg2[%c0, %c0_0] : memref<512x147xbf16, #tpu.memory_space<vmem>>, vector<512x147xbf16>
    %c0_1 = arith.constant 0 : index
    %c0_2 = arith.constant 0 : index
    %1 = vector.load %arg3[%c0_1, %c0_2] : memref<147x64xbf16, #tpu.memory_space<vmem>>, vector<147x64xbf16>
    %cst = arith.constant dense<0.000000e+00> : vector<512x64xf32>
    %2 = tpu.matmul %0, %1, %cst {dimension_numbers = #tpu.dot_dimension_numbers<[1], [0], [0], [1], [0, 0, 1, 1], [], []>} : vector<512x147xbf16>, vector<147x64xbf16>, vector<512x64xf32> -> vector<512x64xf32>
    %c0_3 = arith.constant 0 : index
    %c0_4 = arith.constant 0 : index
    %3 = vector.load %arg4[%c0_3, %c0_4] : memref<1x64xf32, #tpu.memory_space<vmem>>, vector<1x64xf32>
    %4 = vector.broadcast %3 : vector<1x64xf32> to vector<512x64xf32>
    %5 = arith.addf %2, %4 : vector<512x64xf32>
    %cst_5 = arith.constant 0.000000e+00 : f32
    %6 = vector.broadcast %cst_5 : f32 to vector<512x64xf32>
    %7 = arith.maximumf %5, %6 : vector<512x64xf32>
    %8 = arith.truncf %7 : vector<512x64xf32> to vector<512x64xbf16>
    %c0_6 = arith.constant 0 : index
    %c0_7 = arith.constant 0 : index
    %9 = vector.load %arg5[%c0_6, %c0_7] : memref<512x64xbf16, #tpu.memory_space<vmem>>, vector<512x64xbf16>
    tpu.vector_store %arg5[%c0_6, %c0_7], %8 {strides = array<i32>} : memref<512x64xbf16, #tpu.memory_space<vmem>>, vector<512x64xbf16>,
    return
  }
  func.func @transform_0(%arg0: i32, %arg1: i32) -> (i32, i32) {
    %c0_i32 = arith.constant 0 : i32
    %c0_i32_0 = arith.constant 0 : i32
    return %arg0, %c0_i32 : i32, i32
  }
  func.func @transform_1(%arg0: i32, %arg1: i32) -> (i32, i32) {
    %c0_i32 = arith.constant 0 : i32
    %c0_i32_0 = arith.constant 0 : i32
    return %c0_i32, %arg1 : i32, i32
  }
  func.func @transform_2(%arg0: i32, %arg1: i32) -> (i32, i32) {
    %c0_i32 = arith.constant 0 : i32
    %c0_i32_0 = arith.constant 0 : i32
    return %c0_i32, %arg1 : i32, i32
  }
  func.func @transform_3(%arg0: i32, %arg1: i32) -> (i32, i32) {
    %c0_i32 = arith.constant 0 : i32
    return %arg0, %arg1 : i32, i32
  }
}

</mosaic_0001>

<bundles_post_ra>
// kernel: conv_bn_act.1
= control target key start
LH: loop header
LB: loop body
LE: loop exit
PB: predicated region body
PF: predicated region fallthrough
CT: control target
= control target key end

     0   :  { %8 = vsyncpa [#allocation3], 0  ;;  %s2537_s0 = inlined_call_operand.vmem [shape: bf16[2048,147], index: 0, kind: input, shape index: {}]   ;;  %s2538_s1 = inlined_call_operand.vmem [shape: bf16[147,64], index: 1, kind: input, shape index: {}]   ;;  %s2539_s2 = inlined_call_operand.vmem [shape: f32[1,64], index: 2, kind: input, shape index: {}]   ;;  %s2540_s3 = inlined_call_operand.hbm [shape: bf16[2048,64], index: 3, kind: output, shape index: {}]  }
   0x1   :  { %10 = vsyncpa [#allocation3 + $0x1], 0  ;;  %s2091_s12 = smov 0   ;;  %s2093_s13 = smov 0  }
   0x2   :  { %s2095_s14 = smov 0   ;;  %s2097_s15 = smov 0  }
   0x3   :  { %s2099_s16 = smov 0   ;;  %s2101_s17 = smov 0  }
   0x4 LB: > { %s1548_s18 = sadd.s32 4294967295, %s2064_s17   ;;  %s1549_s19 = sadd.s32 4294967294, %s2064_s17   ;;  %s2064_s17 = sphi %s2101_s17, %s16_s17   ;;  %s2060_s16 = sphi %s2099_s16, %s2547_s16   ;;  %s2056_s15 = sphi %s2097_s15, %s2546_s15   ;;  %s2052_s14 = sphi %s2095_s14, %s2545_s14   ;;  %s2048_s13 = sphi %s2093_s13, %s2544_s13   ;;  %s2044_s12 = sphi %s2091_s12, %s2543_s12  }
   0x5   : > { %s28_s20 = sadd.s32 1, %s2060_s16  ;;  %s115_s21 = sadd.s32 1, %s2052_s14 }
   0x6   : > { %p30_p0 = scmp.ge.s32.totalorder %s28_s20, 4  ;;  %p125_p1 = scmp.ne.s32.totalorder %s2052_s14, %s2048_s13 }
   0x7   : > { %p126_p2 = scmp.eq.s32.totalorder %s1548_s18, 3  ;;  %p131_p3 = scmp.ne.s32.totalorder %s2048_s13, %s2044_s12 }
   0x8   : > { %s2549_s20 = smov (%p30_p0, %s28_s20), 0  ;;  %p132_p5 = scmp.eq.s32.totalorder %s1549_s19, 3 }
   0x9   : > { %p2131_p4 = por %p126_p2, %p125_p1  ;;  %s110_s23 = ssub.s32 %s2060_s16, %s2549_s20 }
   0xa   : > { %p1554_p6 = scmp.ge.s32.totalorder %s2064_s17, 1  ;;  %p113_p7 = scmp.eq.s32.totalorder %s110_s23, 0 }
   0xb   : > { %p2138_p8 = por %p132_p5, %p131_p3  ;;  %p173_p9 = scmp.lt.s32.totalorder %s2064_s17, 5 }
   0xc   : > { %s2144_s25 = scalar_select %p113_p7, %s2052_s14, %s115_s21  }
   0xd   : > { %p174_p10 = pnand %p1554_p6, %p173_p9 }
   0xe   : > { %v1880_v0 = vld [vmem:[%s2538_s1] sm:$0xff] (!%p174_p10)   ;;  %v2066_v1 = vmov (!%p174_p10), 0   ;;  %v1881_v2 = vld [vmem:[%s2538_s1 + $0x8] sm:$0xff] (!%p174_p10)   ;;  %v1882_v3 = vld [vmem:[%s2538_s1 + $0x10] sm:$0xff] (!%p174_p10)   ;;  %s1556_s5 = sshll.u32 (!%p174_p10), %s2056_s15, 6  ;;  %vm656_vm0 = vcmask (!%p174_p10), 154624  }
   0xf   : > { %177 = sbr.rel (%p174_p10) target bundleno = 410 (0x19a), region = 32  ;;  %760 = vmatprep.subr.bf16.mxu0 (!%p174_p10), %v2066_v1  ;;  %1801 = vmatprep.subr.bf16.mxu1 (!%p174_p10), %v2066_v1  ;;  %p206_p11 = scmp.lt.s32.totalorder (!%p174_p10), %s1556_s5, 255  ;;  %v1883_v4 = vld [vmem:[%s2538_s1 + $0x18] sm:$0xff] (!%p174_p10)   ;;  %v1884_v5 = vld [vmem:[%s2538_s1 + $0x20] sm:$0xff] (!%p174_p10)   ;;  %v1885_v8 = vld [vmem:[%s2538_s1 + $0x28] sm:$0xff] (!%p174_p10)   ;;  %vm753_vm1 = vcmask (!%p174_p10), 1040384  }
  0x10   : > { %761 = vmatpush1.bf16.msra.mxu0 (!%p174_p10), %v1880_v0  ;;  %1811 = vmatpush1.bf16.msra.mxu1 (!%p174_p10), %v1880_v0  ;;  %v1886_v9 = vld [vmem:[%s2538_s1 + $0x30] sm:$0xff] (!%p174_p10)   ;;  %v1887_v10 = vld [vmem:[%s2538_s1 + $0x38] sm:$0xff] (!%p174_p10)   ;;  %vm754_vm2 = vcmask (!%p174_p10), 1041408   ;;  %v2067_v11 = vmov (!%p174_p10), 65535   ;;  %v1888_v13 = vld [vmem:[%s2538_s1 + $0x40] sm:$0xff] (!%p174_p10)   ;;  %s202_s7 = sand.u32 (!%p174_p10), 1, %s2048_s13  }
  0x11   : > { %762 = vmatprep.subr.bf16.mxu0 (!%p174_p10), %v2066_v1  ;;  %1802 = vmatprep.subr.bf16.mxu1 (!%p174_p10), %v2066_v1  ;;  %v755_v12 = vsel (!%p174_p10), %vm753_vm1, 4294967295, %v2067_v11  ;;  %v1889_v14 = vld [vmem:[%s2538_s1 + $0x48] ss:$0 sps:$4 sm:$0x33] (!%p174_p10)   ;;  %s1555_s10 = sshll.u32 (!%p174_p10), %s202_s7, 8  ;;  %vm1369_vm3 = vcmask (!%p174_p10), 519168  }
  0x12   : > { %v756_v15 = vsel (!%p174_p10), %vm754_vm2, %v755_v12, 0  ;;  %s1800_s18 = sshll.u32 (!%p174_p10), %s2056_s15, 12  ;;  %s2491_s15 = scalar_lea.sflag (!%p174_p10), [#allocation3], %s202_s7 }
  0x13   : > { %v758_v16 = vand.u32 (!%p174_p10), %v1889_v14, %v756_v15  ;;  %v2282_v15 = vld [vmem:[%s2539_s2] ss:$0 sm:$0xff] (!%p174_p10)  ;;  %s2477_s26 = scalar_lea.hbm (!%p174_p10), %s2540_s3, %s1800_s18  ;;  %s2068_s28 = smov (!%p174_p10), [#allocation2]  }
  0x14   : > { %763 = vmatpush1.bf16.msra.mxu0 (!%p174_p10), %v1881_v2  ;;  %1812 = vmatpush1.bf16.msra.mxu1 (!%p174_p10), %v1881_v2  ;;  %s1990_s29 = sshll.u32 (!%p174_p10), %s2068_s28, 4  ;;  %s1991_s29 = int_to_ptr.vmem [resolvable:$false] %s1990_s29 }
  0x15   : > { %764 = vmatprep.subr.bf16.mxu0 (!%p174_p10), %v2066_v1  ;;  %1803 = vmatprep.subr.bf16.mxu1 (!%p174_p10), %v2066_v1  ;;  %s1992_s30 = scalar_lea.vmem (!%p174_p10), %s1991_s29, 8192 }
  0x16   : > { %s2551_s5 = smov (!%p206_p11, %s1556_s5), 255 }
  0x17   : > { %s1735_s8 = sshll.u32 %s2551_s5, 3 }
  0x18   : > { %765 = vmatpush1.bf16.msra.mxu0 %v1882_v3  ;;  %1813 = vmatpush1.bf16.msra.mxu1 %v1882_v3  ;;  %s2162_s11 = scalar_lea.vmem %s2537_s0, %s1735_s8 }
  0x19   : > { %766 = vmatprep.subr.bf16.mxu0 %v2066_v1  ;;  %1804 = vmatprep.subr.bf16.mxu1 %v2066_v1  ;;  %v1892_v6 = vld [vmem:[%s2162_s11 + $0x4] ss:$8 sps:$4 sm:$0xff]   ;;  %v1890_v17 = vld [vmem:[%s2162_s11] ss:$8 sps:$4 sm:$0xff]   ;;  %v1896_v19 = vld [vmem:[%s2162_s11 + $0x14] ss:$8 sps:$4 sm:$0xff]  }
  0x1a   : > { %v1895_v7 = vld [vmem:[%s2162_s11 + $0x104] ss:$8 sps:$4 sm:$0xff]   ;;  %1634 = vmatprep.mubr.msk.bf16.mxu0 %vm656_vm0, %v1892_v6  ;;  %v1893_v18 = vld [vmem:[%s2162_s11 + $0x100] ss:$8 sps:$4 sm:$0xff]   ;;  %v1898_v20 = vld [vmem:[%s2162_s11 + $0x114] ss:$8 sps:$4 sm:$0xff]  }
  0x1b   : > { %1650 = vmatprep.mubr.msk.bf16.mxu1 %vm656_vm0, %v1895_v7  ;;  %v1900_v21 = vld [vmem:[%s2162_s11 + $0x10] ss:$8 sps:$4 sm:$0xff]   ;;  %v1902_v23 = vld [vmem:[%s2162_s11 + $0x24] ss:$8 sps:$4 sm:$0xff]   ;;  %v1906_v25 = vld [vmem:[%s2162_s11 + $0x20] ss:$8 sps:$4 sm:$0xff]  }
  0x1c   : > { %767 = vmatpush1.bf16.msra.mxu0 %v1883_v4  ;;  %1814 = vmatpush1.bf16.msra.mxu1 %v1883_v4  ;;  %v1901_v22 = vld [vmem:[%s2162_s11 + $0x110] ss:$8 sps:$4 sm:$0xff]   ;;  %v1904_v24 = vld [vmem:[%s2162_s11 + $0x124] ss:$8 sps:$4 sm:$0xff]   ;;  %v1907_v26 = vld [vmem:[%s2162_s11 + $0x120] ss:$8 sps:$4 sm:$0xff]  }
  0x1d   : > { %768 = vmatprep.subr.bf16.mxu0 %v2066_v1  ;;  %1805 = vmatprep.subr.bf16.mxu1 %v2066_v1  ;;  %v1908_v27 = vld [vmem:[%s2162_s11 + $0x34] ss:$8 sps:$4 sm:$0xff]   ;;  %v1912_v29 = vld [vmem:[%s2162_s11 + $0x30] ss:$8 sps:$4 sm:$0xff]   ;;  %v1914_v31 = vld [vmem:[%s2162_s11 + $0x44] ss:$8 sps:$4 sm:$0xff]  }
  0x1e   : > { %v1910_v28 = vld [vmem:[%s2162_s11 + $0x134] ss:$8 sps:$4 sm:$0xff]   ;;  %v1913_v30 = vld [vmem:[%s2162_s11 + $0x130] ss:$8 sps:$4 sm:$0xff]   ;;  %v1916_v32 = vld [vmem:[%s2162_s11 + $0x144] ss:$8 sps:$4 sm:$0xff]  }
  0x1f   : > { %v1918_v33 = vld [vmem:[%s2162_s11 + $0x40] ss:$8 sps:$4 sm:$0xff]   ;;  %v1920_v35 = vld [vmem:[%s2162_s11 + $0x54] ss:$8 sps:$4 sm:$0xff]   ;;  %v1924_v37 = vld [vmem:[%s2162_s11 + $0x50] ss:$8 sps:$4 sm:$0xff]  }
  0x20   : > { %769 = vmatpush1.bf16.msra.mxu0 %v1884_v5  ;;  %1815 = vmatpush1.bf16.msra.mxu1 %v1884_v5  ;;  %v1919_v34 = vld [vmem:[%s2162_s11 + $0x140] ss:$8 sps:$4 sm:$0xff]   ;;  %v1922_v36 = vld [vmem:[%s2162_s11 + $0x154] ss:$8 sps:$4 sm:$0xff]   ;;  %v1925_v38 = vld [vmem:[%s2162_s11 + $0x150] ss:$8 sps:$4 sm:$0xff]  }
  0x21   : > { %770 = vmatprep.subr.bf16.mxu0 %v2066_v1  ;;  %1806 = vmatprep.subr.bf16.mxu1 %v2066_v1  ;;  %v1926_v39 = vld [vmem:[%s2162_s11 + $0x64] ss:$8 sps:$4 sm:$0xff]   ;;  %v1930_v41 = vld [vmem:[%s2162_s11 + $0x60] ss:$8 sps:$4 sm:$0xff]   ;;  %v1932_v43 = vld [vmem:[%s2162_s11 + $0x74] ss:$8 sps:$4 sm:$0xff]  }
  0x22   : > { %v1928_v40 = vld [vmem:[%s2162_s11 + $0x164] ss:$8 sps:$4 sm:$0xff]   ;;  %v1931_v42 = vld [vmem:[%s2162_s11 + $0x160] ss:$8 sps:$4 sm:$0xff]   ;;  %v1934_v44 = vld [vmem:[%s2162_s11 + $0x174] ss:$8 sps:$4 sm:$0xff]  }
  0x23   : > { %v1936_v45 = vld [vmem:[%s2162_s11 + $0x70] ss:$8 sps:$4 sm:$0xff]   ;;  %v1938_v47 = vld [vmem:[%s2162_s11 + $0x84] ss:$8 sps:$4 sm:$0xff]   ;;  %v1942_v49 = vld [vmem:[%s2162_s11 + $0x80] ss:$8 sps:$4 sm:$0xff]  }
  0x24   : > { %771 = vmatpush1.bf16.msra.mxu0 %v1885_v8  ;;  %1816 = vmatpush1.bf16.msra.mxu1 %v1885_v8  ;;  %v1937_v46 = vld [vmem:[%s2162_s11 + $0x170] ss:$8 sps:$4 sm:$0xff]   ;;  %v1940_v48 = vld [vmem:[%s2162_s11 + $0x184] ss:$8 sps:$4 sm:$0xff]   ;;  %v1943_v50 = vld [vmem:[%s2162_s11 + $0x180] ss:$8 sps:$4 sm:$0xff]  }
  0x25   : > { %772 = vmatprep.subr.bf16.mxu0 %v2066_v1  ;;  %1807 = vmatprep.subr.bf16.mxu1 %v2066_v1  ;;  %v1944_v51 = vld [vmem:[%s2162_s11 + $0x94] ss:$8 sps:$4 sm:$0xff]   ;;  %v1948_v53 = vld [vmem:[%s2162_s11 + $0x90] ss:$8 sps:$4 sm:$0xff]   ;;  %v1950_v55 = vld [vmem:[%s2162_s11 + $0xa4] ss:$8 sps:$4 sm:$0xff]  }
  0x26   : > { %v1946_v52 = vld [vmem:[%s2162_s11 + $0x194] ss:$8 sps:$4 sm:$0xff]   ;;  %v1949_v54 = vld [vmem:[%s2162_s11 + $0x190] ss:$8 sps:$4 sm:$0xff]   ;;  %v1952_v56 = vld [vmem:[%s2162_s11 + $0x1a4] ss:$8 sps:$4 sm:$0xff]  }
  0x27   : > { %v1954_v57 = vld [vmem:[%s2162_s11 + $0xa0] ss:$8 sps:$4 sm:$0xff]   ;;  %v1956_v59 = vld [vmem:[%s2162_s11 + $0xb4] ss:$8 sps:$4 sm:$0xff]   ;;  %v1960_v61 = vld [vmem:[%s2162_s11 + $0xb0] ss:$8 sps:$4 sm:$0xff]  }
  0x28   : > { %773 = vmatpush1.bf16.msra.mxu0 %v1886_v9  ;;  %1817 = vmatpush1.bf16.msra.mxu1 %v1886_v9  ;;  %v1955_v58 = vld [vmem:[%s2162_s11 + $0x1a0] ss:$8 sps:$4 sm:$0xff]   ;;  %v1958_v60 = vld [vmem:[%s2162_s11 + $0x1b4] ss:$8 sps:$4 sm:$0xff]   ;;  %v1961_v62 = vld [vmem:[%s2162_s11 + $0x1b0] ss:$8 sps:$4 sm:$0xff]  }
  0x29   : > { %774 = vmatprep.subr.bf16.mxu0 %v2066_v1  ;;  %1808 = vmatprep.subr.bf16.mxu1 %v2066_v1  ;;  %v1962_v63 = vld [vmem:[%s2162_s11 + $0xc4] ss:$8 sps:$4 sm:$0xff]   ;;  %v1967_v2 = vld [vmem:[%s2162_s11 + $0x1c0] ss:$8 sps:$4 sm:$0xff]   ;;  %v1968_v3 = vld [vmem:[%s2162_s11 + $0xd4] ss:$8 sps:$4 sm:$0xff]  }
  0x2a   : > { %v1964_v0 = vld [vmem:[%s2162_s11 + $0x1c4] ss:$8 sps:$4 sm:$0xff]   ;;  %v1970_v4 = vld [vmem:[%s2162_s11 + $0x1d4] ss:$8 sps:$4 sm:$0xff]   ;;  %v1972_v5 = vld [vmem:[%s2162_s11 + $0xd0] ss:$8 sps:$4 sm:$0xff]  }
  0x2b   : > { %v1973_v6 = vld [vmem:[%s2162_s11 + $0x1d0] ss:$8 sps:$4 sm:$0xff]   ;;  %v1974_v7 = vld [vmem:[%s2162_s11 + $0xe4] ss:$8 sps:$4 sm:$0xff]   ;;  %v1978_v9 = vld [vmem:[%s2162_s11 + $0xe0] ss:$8 sps:$4 sm:$0xff]  }
  0x2c   : > { %775 = vmatpush1.bf16.msra.mxu0 %v1887_v10  ;;  %1818 = vmatpush1.bf16.msra.mxu1 %v1887_v10  ;;  %v1976_v8 = vld [vmem:[%s2162_s11 + $0x1e4] ss:$8 sps:$4 sm:$0xff]   ;;  %v1979_v10 = vld [vmem:[%s2162_s11 + $0x1e0] ss:$8 sps:$4 sm:$0xff]   ;;  %v1980_v11 = vld [vmem:[%s2162_s11 + $0xf4] ss:$8 sps:$4 sm:$0xff]  }
  0x2d   : > { %776 = vmatprep.subr.bf16.mxu0 %v2066_v1  ;;  %1809 = vmatprep.subr.bf16.mxu1 %v2066_v1  ;;  %v1982_v12 = vld [vmem:[%s2162_s11 + $0x1f4] ss:$8 sps:$4 sm:$0xff]   ;;  %v1985_v14 = vld [vmem:[%s2162_s11 + $0x1f0] ss:$8 sps:$4 sm:$0xff]  }
  0x30   : > { %777 = vmatpush1.bf16.msra.mxu0 %v1888_v13  ;;  %1819 = vmatpush1.bf16.msra.mxu1 %v1888_v13  ;;  %v1984_v13 = vld [vmem:[%s2162_s11 + $0xf0] ss:$8 sps:$4 sm:$0xff]  }
  0x31   : > { %778 = vmatprep.subr.bf16.mxu0 %v2066_v1  ;;  %1810 = vmatprep.subr.bf16.mxu1 %v2066_v1  ;;  %v1966_v1 = vld [vmem:[%s2162_s11 + $0xc0] ss:$8 sps:$4 sm:$0xff]   ;;  %s2290_s11 = scalar_lea.vmem [#allocation2], %s1555_s10 }
  0x32   : > { %s1449_s19 = sshll.u32 %s2290_s11, 4  ;;  %s2479_s19 = int_to_ptr.vmem [resolvable:$true] %s1449_s19 }
  0x33   : > { %s1986_s27 = scalar_lea.vmem %s2479_s19, 4096  ;;  %p1993_p1 = scmp.lt.s32.totalorder %s2479_s19, %s1991_s29 }
  0x34   : > { %779 = vmatpush1.bf16.msra.mxu0 %v758_v16  ;;  %1820 = vmatpush1.bf16.msra.mxu1 %v758_v16  ;;  %p1987_p12 = scmp.ne.s32.totalorder %s2479_s19, %s1986_s27  ;;  %p1994_p2 = scmp.lt.s32.totalorder %s1992_s30, %s1986_s27 }
  0x36   : > { %p1988_p13 = pnand %p1987_p12, %p2131_p4  ;;  %p1995_p3 = por %p1994_p2, %p1993_p1 }
  0x37   : > { %793 = vmatmul.mubr.bf16.vlgmr.msra.gmra.mrb[0].mxu0 %v1890_v17  ;;  %921 = vmatmul.mubr.bf16.vlgmr.msra.gmra.mrb[0].mxu1 %v1893_v18 }
  0x38   : > { %1635 = vmatprep.mubr.msk.bf16.mxu0 %vm656_vm0, %v1896_v19  ;;  %1651 = vmatprep.mubr.msk.bf16.mxu1 %vm656_vm0, %v1898_v20  ;;  %p1989_p0 = pneg %p1988_p13 }
  0x3a   : > { %p1996_p5 = pnand %p1995_p3, %p1989_p0 }
  0x3f   : > { %801 = vmatmul.mubr.bf16.gmra.mrb[4].mxu0 %v1900_v21  ;;  %929 = vmatmul.mubr.bf16.gmra.mrb[4].mxu1 %v1901_v22 }
  0x40   : > { %1636 = vmatprep.mubr.msk.bf16.mxu0 %vm656_vm0, %v1902_v23  ;;  %1652 = vmatprep.mubr.msk.bf16.mxu1 %vm656_vm0, %v1904_v24 }
  0x47   : > { %809 = vmatmul.mubr.bf16.gmra.mrb[8].mxu0 %v1906_v25  ;;  %937 = vmatmul.mubr.bf16.gmra.mrb[8].mxu1 %v1907_v26 }
  0x48   : > { %1637 = vmatprep.mubr.msk.bf16.mxu0 %vm656_vm0, %v1908_v27  ;;  %1653 = vmatprep.mubr.msk.bf16.mxu1 %vm656_vm0, %v1910_v28 }
  0x4f   : > { %817 = vmatmul.mubr.bf16.gmra.mrb[12].mxu0 %v1912_v29  ;;  %945 = vmatmul.mubr.bf16.gmra.mrb[12].mxu1 %v1913_v30 }
  0x50   : > { %1638 = vmatprep.mubr.msk.bf16.mxu0 %vm656_vm0, %v1914_v31  ;;  %1654 = vmatprep.mubr.msk.bf16.mxu1 %vm656_vm0, %v1916_v32 }
  0x57   : > { %825 = vmatmul.mubr.bf16.gmra.mrb[16].mxu0 %v1918_v33  ;;  %953 = vmatmul.mubr.bf16.gmra.mrb[16].mxu1 %v1919_v34 }
  0x58   : > { %1639 = vmatprep.mubr.msk.bf16.mxu0 %vm656_vm0, %v1920_v35  ;;  %1655 = vmatprep.mubr.msk.bf16.mxu1 %vm656_vm0, %v1922_v36 }
  0x5f   : > { %833 = vmatmul.mubr.bf16.gmra.mrb[20].mxu0 %v1924_v37  ;;  %961 = vmatmul.mubr.bf16.gmra.mrb[20].mxu1 %v1925_v38 }
  0x60   : > { %1640 = vmatprep.mubr.msk.bf16.mxu0 %vm656_vm0, %v1926_v39  ;;  %1656 = vmatprep.mubr.msk.bf16.mxu1 %vm656_vm0, %v1928_v40 }
  0x67   : > { %841 = vmatmul.mubr.bf16.gmra.mrb[24].mxu0 %v1930_v41  ;;  %969 = vmatmul.mubr.bf16.gmra.mrb[24].mxu1 %v1931_v42 }
  0x68   : > { %1641 = vmatprep.mubr.msk.bf16.mxu0 %vm656_vm0, %v1932_v43  ;;  %1657 = vmatprep.mubr.msk.bf16.mxu1 %vm656_vm0, %v1934_v44 }
  0x6f   : > { %849 = vmatmul.mubr.bf16.gmra.mrb[28].mxu0 %v1936_v45  ;;  %977 = vmatmul.mubr.bf16.gmra.mrb[28].mxu1 %v1937_v46 }
  0x70   : > { %1642 = vmatprep.mubr.msk.bf16.mxu0 %vm656_vm0, %v1938_v47  ;;  %1658 = vmatprep.mubr.msk.bf16.mxu1 %vm656_vm0, %v1940_v48 }
  0x77   : > { %857 = vmatmul.mubr.bf16.gmra.mrb[32].mxu0 %v1942_v49  ;;  %985 = vmatmul.mubr.bf16.gmra.mrb[32].mxu1 %v1943_v50 }
  0x78   : > { %1643 = vmatprep.mubr.msk.bf16.mxu0 %vm656_vm0, %v1944_v51  ;;  %1659 = vmatprep.mubr.msk.bf16.mxu1 %vm656_vm0, %v1946_v52 }
  0x7f   : > { %865 = vmatmul.mubr.bf16.gmra.mrb[36].mxu0 %v1948_v53  ;;  %993 = vmatmul.mubr.bf16.gmra.mrb[36].mxu1 %v1949_v54 }
  0x80   : > { %1644 = vmatprep.mubr.msk.bf16.mxu0 %vm656_vm0, %v1950_v55  ;;  %1660 = vmatprep.mubr.msk.bf16.mxu1 %vm656_vm0, %v1952_v56 }
  0x87   : > { %873 = vmatmul.mubr.bf16.gmra.mrb[40].mxu0 %v1954_v57  ;;  %1001 = vmatmul.mubr.bf16.gmra.mrb[40].mxu1 %v1955_v58 }
  0x88   : > { %1645 = vmatprep.mubr.msk.bf16.mxu0 %vm656_vm0, %v1956_v59  ;;  %1661 = vmatprep.mubr.msk.bf16.mxu1 %vm656_vm0, %v1958_v60 }
  0x8f   : > { %881 = vmatmul.mubr.bf16.gmra.mrb[44].mxu0 %v1960_v61  ;;  %1009 = vmatmul.mubr.bf16.gmra.mrb[44].mxu1 %v1961_v62 }
  0x90   : > { %1646 = vmatprep.mubr.msk.bf16.mxu0 %vm656_vm0, %v1962_v63  ;;  %1662 = vmatprep.mubr.msk.bf16.mxu1 %vm656_vm0, %v1964_v0 }
  0x97   : > { %889 = vmatmul.mubr.bf16.gmra.mrb[48].mxu0 %v1966_v1  ;;  %1017 = vmatmul.mubr.bf16.gmra.mrb[48].mxu1 %v1967_v2 }
  0x98   : > { %1647 = vmatprep.mubr.msk.bf16.mxu0 %vm656_vm0, %v1968_v3  ;;  %1663 = vmatprep.mubr.msk.bf16.mxu1 %vm656_vm0, %v1970_v4 }
  0x9f   : > { %897 = vmatmul.mubr.bf16.gmra.mrb[52].mxu0 %v1972_v5  ;;  %1025 = vmatmul.mubr.bf16.gmra.mrb[52].mxu1 %v1973_v6 }
  0xa0   : > { %1648 = vmatprep.mubr.msk.bf16.mxu0 %vm656_vm0, %v1974_v7  ;;  %1664 = vmatprep.mubr.msk.bf16.mxu1 %vm656_vm0, %v1976_v8 }
  0xa7   : > { %905 = vmatmul.mubr.bf16.gmra.mrb[56].mxu0 %v1978_v9  ;;  %1033 = vmatmul.mubr.bf16.gmra.mrb[56].mxu1 %v1979_v10 }
  0xa8   : > { %1649 = vmatprep.mubr.msk.bf16.mxu0 %vm656_vm0, %v1980_v11  ;;  %1665 = vmatprep.mubr.msk.bf16.mxu1 %vm656_vm0, %v1982_v12 }
  0xaf   : > { %913 = vmatmul.mubr.bf16.gmra.mrb[60].mxu0 %v1984_v13  ;;  %1041 = vmatmul.mubr.bf16.gmra.mrb[60].mxu1 %v1985_v14 }
 0x10a   : > { %v794_v16 = vpop.f32.mrb[0].mxu0  ;;  %v922_v17 = vpop.f32.mrb[0].mxu1 }
 0x10b   : > { %v795_v18 = vadd.f32 %v2282_v15, %v794_v16  ;;  %v923_v19 = vadd.f32 %v2282_v15, %v922_v17  ;;  %v796_v20 = vpop.f32.mrb[1].mxu0  ;;  %v924_v21 = vpop.f32.mrb[1].mxu1 }
 0x10c   : > { %v797_v22 = vpop.f32.mrb[2].mxu0  ;;  %v925_v23 = vpop.f32.mrb[2].mxu1 }
 0x10d   : > { %v1049_v24 = vmax.f32 %v795_v18, 0.0  ;;  %v1081_v25 = vmax.f32 %v923_v19, 0.0  ;;  %v798_v26 = vadd.f32 %v2282_v15, %v797_v22  ;;  %v926_v27 = vadd.f32 %v2282_v15, %v925_v23  ;;  %v799_v28 = vpop.f32.mrb[3].mxu0  ;;  %v927_v29 = vpop.f32.mrb[3].mxu1 }
 0x10f   : > { %v1736_v30 = vpack.c.bf16 %v1049_v24, %v1049_v24  ;;  %v1768_v31 = vpack.c.bf16 %v1081_v25, %v1081_v25  ;;  %v1050_v32 = vmax.f32 %v798_v26, 0.0  ;;  %v1082_v33 = vmax.f32 %v926_v27, 0.0 }
 0x111   : > { %1370 = vst.msk [vmem:[%s2290_s11] sm:$0xf] %vm1369_vm3, %v1736_v30  ;;  %1402 = vst.msk [vmem:[%s2290_s11 + $0x80] sm:$0xf] %vm1369_vm3, %v1768_v31  ;;  %v1737_v34 = vpack.c.bf16 %v1050_v32, %v1050_v32  ;;  %v1769_v35 = vpack.c.bf16 %v1082_v33, %v1082_v33 }
 0x112   : > { %v802_v36 = vpop.f32.mrb[4].mxu0  ;;  %v930_v37 = vpop.f32.mrb[4].mxu1 }
 0x113   : > { %1371 = vst.msk [vmem:[%s2290_s11 + $0x4] sm:$0xf] %vm1369_vm3, %v1737_v34  ;;  %1403 = vst.msk [vmem:[%s2290_s11 + $0x84] sm:$0xf] %vm1369_vm3, %v1769_v35  ;;  %v803_v38 = vadd.f32 %v2282_v15, %v802_v36  ;;  %v931_v39 = vadd.f32 %v2282_v15, %v930_v37  ;;  %v804_v40 = vpop.f32.mrb[5].mxu0  ;;  %v932_v41 = vpop.f32.mrb[5].mxu1 }
 0x114   : > { %v805_v42 = vpop.f32.mrb[6].mxu0  ;;  %v933_v43 = vpop.f32.mrb[6].mxu1 }
 0x115   : > { %v1051_v44 = vmax.f32 %v803_v38, 0.0  ;;  %v1083_v45 = vmax.f32 %v931_v39, 0.0  ;;  %v806_v46 = vadd.f32 %v2282_v15, %v805_v42  ;;  %v934_v47 = vadd.f32 %v2282_v15, %v933_v43  ;;  %v807_v48 = vpop.f32.mrb[7].mxu0  ;;  %v935_v49 = vpop.f32.mrb[7].mxu1 }
 0x117   : > { %v1738_v50 = vpack.c.bf16 %v1051_v44, %v1051_v44  ;;  %v1770_v51 = vpack.c.bf16 %v1083_v45, %v1083_v45  ;;  %v1052_v52 = vmax.f32 %v806_v46, 0.0  ;;  %v1084_v53 = vmax.f32 %v934_v47, 0.0 }
 0x119   : > { %1372 = vst.msk [vmem:[%s2290_s11 + $0x8] sm:$0xf] %vm1369_vm3, %v1738_v50  ;;  %1404 = vst.msk [vmem:[%s2290_s11 + $0x88] sm:$0xf] %vm1369_vm3, %v1770_v51  ;;  %v1739_v54 = vpack.c.bf16 %v1052_v52, %v1052_v52  ;;  %v1771_v55 = vpack.c.bf16 %v1084_v53, %v1084_v53 }
 0x11a   : > { %v810_v56 = vpop.f32.mrb[8].mxu0  ;;  %v938_v57 = vpop.f32.mrb[8].mxu1 }
 0x11b   : > { %1373 = vst.msk [vmem:[%s2290_s11 + $0xc] sm:$0xf] %vm1369_vm3, %v1739_v54  ;;  %1405 = vst.msk [vmem:[%s2290_s11 + $0x8c] sm:$0xf] %vm1369_vm3, %v1771_v55  ;;  %v811_v58 = vadd.f32 %v2282_v15, %v810_v56  ;;  %v939_v59 = vadd.f32 %v2282_v15, %v938_v57  ;;  %v812_v60 = vpop.f32.mrb[9].mxu0  ;;  %v940_v61 = vpop.f32.mrb[9].mxu1 }
 0x11c   : > { %v813_v62 = vpop.f32.mrb[10].mxu0  ;;  %v941_v63 = vpop.f32.mrb[10].mxu1 }
 0x11d   : > { %v1053_v0 = vmax.f32 %v811_v58, 0.0  ;;  %v1085_v1 = vmax.f32 %v939_v59, 0.0  ;;  %v814_v2 = vadd.f32 %v2282_v15, %v813_v62  ;;  %v942_v3 = vadd.f32 %v2282_v15, %v941_v63  ;;  %v815_v4 = vpop.f32.mrb[11].mxu0  ;;  %v943_v5 = vpop.f32.mrb[11].mxu1 }
 0x11f   : > { %v1740_v6 = vpack.c.bf16 %v1053_v0, %v1053_v0  ;;  %v1772_v7 = vpack.c.bf16 %v1085_v1, %v1085_v1  ;;  %v1054_v8 = vmax.f32 %v814_v2, 0.0  ;;  %v1086_v9 = vmax.f32 %v942_v3, 0.0 }
 0x121   : > { %1374 = vst.msk [vmem:[%s2290_s11 + $0x10] sm:$0xf] %vm1369_vm3, %v1740_v6  ;;  %1406 = vst.msk [vmem:[%s2290_s11 + $0x90] sm:$0xf] %vm1369_vm3, %v1772_v7  ;;  %v1741_v10 = vpack.c.bf16 %v1054_v8, %v1054_v8  ;;  %v1773_v11 = vpack.c.bf16 %v1086_v9, %v1086_v9 }
 0x122   : > { %v818_v12 = vpop.f32.mrb[12].mxu0  ;;  %v946_v13 = vpop.f32.mrb[12].mxu1 }
 0x123   : > { %1375 = vst.msk [vmem:[%s2290_s11 + $0x14] sm:$0xf] %vm1369_vm3, %v1741_v10  ;;  %1407 = vst.msk [vmem:[%s2290_s11 + $0x94] sm:$0xf] %vm1369_vm3, %v1773_v11  ;;  %v819_v14 = vadd.f32 %v2282_v15, %v818_v12  ;;  %v947_v16 = vadd.f32 %v2282_v15, %v946_v13  ;;  %v820_v17 = vpop.f32.mrb[13].mxu0  ;;  %v948_v18 = vpop.f32.mrb[13].mxu1 }
 0x124   : > { %v821_v19 = vpop.f32.mrb[14].mxu0  ;;  %v949_v20 = vpop.f32.mrb[14].mxu1 }
 0x125   : > { %v1055_v21 = vmax.f32 %v819_v14, 0.0  ;;  %v1087_v22 = vmax.f32 %v947_v16, 0.0  ;;  %v822_v23 = vadd.f32 %v2282_v15, %v821_v19  ;;  %v950_v24 = vadd.f32 %v2282_v15, %v949_v20  ;;  %v823_v25 = vpop.f32.mrb[15].mxu0  ;;  %v951_v26 = vpop.f32.mrb[15].mxu1 }
 0x127   : > { %v1742_v27 = vpack.c.bf16 %v1055_v21, %v1055_v21  ;;  %v1774_v28 = vpack.c.bf16 %v1087_v22, %v1087_v22  ;;  %v1056_v29 = vmax.f32 %v822_v23, 0.0  ;;  %v1088_v30 = vmax.f32 %v950_v24, 0.0 }
 0x129   : > { %1376 = vst.msk [vmem:[%s2290_s11 + $0x18] sm:$0xf] %vm1369_vm3, %v1742_v27  ;;  %1408 = vst.msk [vmem:[%s2290_s11 + $0x98] sm:$0xf] %vm1369_vm3, %v1774_v28  ;;  %v1743_v31 = vpack.c.bf16 %v1056_v29, %v1056_v29  ;;  %v1775_v32 = vpack.c.bf16 %v1088_v30, %v1088_v30 }
 0x12a   : > { %v826_v33 = vpop.f32.mrb[16].mxu0  ;;  %v954_v34 = vpop.f32.mrb[16].mxu1 }
 0x12b   : > { %1377 = vst.msk [vmem:[%s2290_s11 + $0x1c] sm:$0xf] %vm1369_vm3, %v1743_v31  ;;  %1409 = vst.msk [vmem:[%s2290_s11 + $0x9c] sm:$0xf] %vm1369_vm3, %v1775_v32  ;;  %v827_v35 = vadd.f32 %v2282_v15, %v826_v33  ;;  %v955_v36 = vadd.f32 %v2282_v15, %v954_v34  ;;  %v828_v37 = vpop.f32.mrb[17].mxu0  ;;  %v956_v38 = vpop.f32.mrb[17].mxu1 }
 0x12c   : > { %v829_v39 = vpop.f32.mrb[18].mxu0  ;;  %v957_v40 = vpop.f32.mrb[18].mxu1 }
 0x12d   : > { %v1057_v41 = vmax.f32 %v827_v35, 0.0  ;;  %v1089_v42 = vmax.f32 %v955_v36, 0.0  ;;  %v830_v43 = vadd.f32 %v2282_v15, %v829_v39  ;;  %v958_v44 = vadd.f32 %v2282_v15, %v957_v40  ;;  %v831_v45 = vpop.f32.mrb[19].mxu0  ;;  %v959_v46 = vpop.f32.mrb[19].mxu1 }
 0x12f   : > { %v1744_v47 = vpack.c.bf16 %v1057_v41, %v1057_v41  ;;  %v1776_v48 = vpack.c.bf16 %v1089_v42, %v1089_v42  ;;  %v1058_v49 = vmax.f32 %v830_v43, 0.0  ;;  %v1090_v50 = vmax.f32 %v958_v44, 0.0 }
 0x131   : > { %1378 = vst.msk [vmem:[%s2290_s11 + $0x20] sm:$0xf] %vm1369_vm3, %v1744_v47  ;;  %1410 = vst.msk [vmem:[%s2290_s11 + $0xa0] sm:$0xf] %vm1369_vm3, %v1776_v48  ;;  %v1745_v51 = vpack.c.bf16 %v1058_v49, %v1058_v49  ;;  %v1777_v52 = vpack.c.bf16 %v1090_v50, %v1090_v50 }
 0x132   : > { %v834_v53 = vpop.f32.mrb[20].mxu0  ;;  %v962_v54 = vpop.f32.mrb[20].mxu1 }
 0x133   : > { %1379 = vst.msk [vmem:[%s2290_s11 + $0x24] sm:$0xf] %vm1369_vm3, %v1745_v51  ;;  %1411 = vst.msk [vmem:[%s2290_s11 + $0xa4] sm:$0xf] %vm1369_vm3, %v1777_v52  ;;  %v835_v55 = vadd.f32 %v2282_v15, %v834_v53  ;;  %v963_v56 = vadd.f32 %v2282_v15, %v962_v54  ;;  %v836_v57 = vpop.f32.mrb[21].mxu0  ;;  %v964_v58 = vpop.f32.mrb[21].mxu1 }
 0x134   : > { %v837_v59 = vpop.f32.mrb[22].mxu0  ;;  %v965_v60 = vpop.f32.mrb[22].mxu1 }
 0x135   : > { %v1059_v61 = vmax.f32 %v835_v55, 0.0  ;;  %v1091_v62 = vmax.f32 %v963_v56, 0.0  ;;  %v838_v63 = vadd.f32 %v2282_v15, %v837_v59  ;;  %v966_v0 = vadd.f32 %v2282_v15, %v965_v60  ;;  %v839_v1 = vpop.f32.mrb[23].mxu0  ;;  %v967_v2 = vpop.f32.mrb[23].mxu1 }
 0x137   : > { %v1746_v3 = vpack.c.bf16 %v1059_v61, %v1059_v61  ;;  %v1778_v4 = vpack.c.bf16 %v1091_v62, %v1091_v62  ;;  %v1060_v5 = vmax.f32 %v838_v63, 0.0  ;;  %v1092_v6 = vmax.f32 %v966_v0, 0.0 }
 0x139   : > { %1380 = vst.msk [vmem:[%s2290_s11 + $0x28] sm:$0xf] %vm1369_vm3, %v1746_v3  ;;  %1412 = vst.msk [vmem:[%s2290_s11 + $0xa8] sm:$0xf] %vm1369_vm3, %v1778_v4  ;;  %v1747_v7 = vpack.c.bf16 %v1060_v5, %v1060_v5  ;;  %v1779_v8 = vpack.c.bf16 %v1092_v6, %v1092_v6 }
 0x13a   : > { %v842_v9 = vpop.f32.mrb[24].mxu0  ;;  %v970_v10 = vpop.f32.mrb[24].mxu1 }
 0x13b   : > { %1381 = vst.msk [vmem:[%s2290_s11 + $0x2c] sm:$0xf] %vm1369_vm3, %v1747_v7  ;;  %1413 = vst.msk [vmem:[%s2290_s11 + $0xac] sm:$0xf] %vm1369_vm3, %v1779_v8  ;;  %v843_v11 = vadd.f32 %v2282_v15, %v842_v9  ;;  %v971_v12 = vadd.f32 %v2282_v15, %v970_v10  ;;  %v844_v13 = vpop.f32.mrb[25].mxu0  ;;  %v972_v14 = vpop.f32.mrb[25].mxu1 }
 0x13c   : > { %v845_v16 = vpop.f32.mrb[26].mxu0  ;;  %v973_v17 = vpop.f32.mrb[26].mxu1 }
 0x13d   : > { %v1061_v18 = vmax.f32 %v843_v11, 0.0  ;;  %v1093_v19 = vmax.f32 %v971_v12, 0.0  ;;  %v846_v20 = vadd.f32 %v2282_v15, %v845_v16  ;;  %v974_v21 = vadd.f32 %v2282_v15, %v973_v17  ;;  %v847_v22 = vpop.f32.mrb[27].mxu0  ;;  %v975_v23 = vpop.f32.mrb[27].mxu1 }
 0x13f   : > { %v1748_v24 = vpack.c.bf16 %v1061_v18, %v1061_v18  ;;  %v1780_v25 = vpack.c.bf16 %v1093_v19, %v1093_v19  ;;  %v1062_v26 = vmax.f32 %v846_v20, 0.0  ;;  %v1094_v27 = vmax.f32 %v974_v21, 0.0 }
 0x141   : > { %1382 = vst.msk [vmem:[%s2290_s11 + $0x30] sm:$0xf] %vm1369_vm3, %v1748_v24  ;;  %1414 = vst.msk [vmem:[%s2290_s11 + $0xb0] sm:$0xf] %vm1369_vm3, %v1780_v25  ;;  %v1749_v28 = vpack.c.bf16 %v1062_v26, %v1062_v26  ;;  %v1781_v29 = vpack.c.bf16 %v1094_v27, %v1094_v27 }
 0x142   : > { %v850_v30 = vpop.f32.mrb[28].mxu0  ;;  %v978_v31 = vpop.f32.mrb[28].mxu1 }
 0x143   : > { %1383 = vst.msk [vmem:[%s2290_s11 + $0x34] sm:$0xf] %vm1369_vm3, %v1749_v28  ;;  %1415 = vst.msk [vmem:[%s2290_s11 + $0xb4] sm:$0xf] %vm1369_vm3, %v1781_v29  ;;  %v851_v32 = vadd.f32 %v2282_v15, %v850_v30  ;;  %v979_v33 = vadd.f32 %v2282_v15, %v978_v31  ;;  %v852_v34 = vpop.f32.mrb[29].mxu0  ;;  %v980_v35 = vpop.f32.mrb[29].mxu1 }
 0x144   : > { %v853_v36 = vpop.f32.mrb[30].mxu0  ;;  %v981_v37 = vpop.f32.mrb[30].mxu1 }
 0x145   : > { %v1063_v38 = vmax.f32 %v851_v32, 0.0  ;;  %v1095_v39 = vmax.f32 %v979_v33, 0.0  ;;  %v854_v40 = vadd.f32 %v2282_v15, %v853_v36  ;;  %v982_v41 = vadd.f32 %v2282_v15, %v981_v37  ;;  %v855_v42 = vpop.f32.mrb[31].mxu0  ;;  %v983_v43 = vpop.f32.mrb[31].mxu1 }
 0x147   : > { %v1750_v44 = vpack.c.bf16 %v1063_v38, %v1063_v38  ;;  %v1782_v45 = vpack.c.bf16 %v1095_v39, %v1095_v39  ;;  %v1064_v46 = vmax.f32 %v854_v40, 0.0  ;;  %v1096_v47 = vmax.f32 %v982_v41, 0.0 }
 0x149   : > { %1384 = vst.msk [vmem:[%s2290_s11 + $0x38] sm:$0xf] %vm1369_vm3, %v1750_v44  ;;  %1416 = vst.msk [vmem:[%s2290_s11 + $0xb8] sm:$0xf] %vm1369_vm3, %v1782_v45  ;;  %v1751_v48 = vpack.c.bf16 %v1064_v46, %v1064_v46  ;;  %v1783_v49 = vpack.c.bf16 %v1096_v47, %v1096_v47 }
 0x14a   : > { %v858_v50 = vpop.f32.mrb[32].mxu0  ;;  %v986_v51 = vpop.f32.mrb[32].mxu1 }
 0x14b   : > { %1385 = vst.msk [vmem:[%s2290_s11 + $0x3c] sm:$0xf] %vm1369_vm3, %v1751_v48  ;;  %1417 = vst.msk [vmem:[%s2290_s11 + $0xbc] sm:$0xf] %vm1369_vm3, %v1783_v49  ;;  %v859_v52 = vadd.f32 %v2282_v15, %v858_v50  ;;  %v987_v53 = vadd.f32 %v2282_v15, %v986_v51  ;;  %v860_v54 = vpop.f32.mrb[33].mxu0  ;;  %v988_v55 = vpop.f32.mrb[33].mxu1 }
 0x14c   : > { %v861_v56 = vpop.f32.mrb[34].mxu0  ;;  %v989_v57 = vpop.f32.mrb[34].mxu1 }
 0x14d   : > { %v1065_v58 = vmax.f32 %v859_v52, 0.0  ;;  %v1097_v59 = vmax.f32 %v987_v53, 0.0  ;;  %v862_v60 = vadd.f32 %v2282_v15, %v861_v56  ;;  %v990_v61 = vadd.f32 %v2282_v15, %v989_v57  ;;  %v863_v62 = vpop.f32.mrb[35].mxu0  ;;  %v991_v63 = vpop.f32.mrb[35].mxu1 }
 0x14f   : > { %v1752_v0 = vpack.c.bf16 %v1065_v58, %v1065_v58  ;;  %v1784_v1 = vpack.c.bf16 %v1097_v59, %v1097_v59  ;;  %v1066_v2 = vmax.f32 %v862_v60, 0.0  ;;  %v1098_v3 = vmax.f32 %v990_v61, 0.0 }
 0x151   : > { %1386 = vst.msk [vmem:[%s2290_s11 + $0x40] sm:$0xf] %vm1369_vm3, %v1752_v0  ;;  %1418 = vst.msk [vmem:[%s2290_s11 + $0xc0] sm:$0xf] %vm1369_vm3, %v1784_v1  ;;  %v1753_v4 = vpack.c.bf16 %v1066_v2, %v1066_v2  ;;  %v1785_v5 = vpack.c.bf16 %v1098_v3, %v1098_v3 }
 0x152   : > { %v866_v6 = vpop.f32.mrb[36].mxu0  ;;  %v994_v7 = vpop.f32.mrb[36].mxu1 }
 0x153   : > { %1387 = vst.msk [vmem:[%s2290_s11 + $0x44] sm:$0xf] %vm1369_vm3, %v1753_v4  ;;  %1419 = vst.msk [vmem:[%s2290_s11 + $0xc4] sm:$0xf] %vm1369_vm3, %v1785_v5  ;;  %v867_v8 = vadd.f32 %v2282_v15, %v866_v6  ;;  %v995_v9 = vadd.f32 %v2282_v15, %v994_v7  ;;  %v868_v10 = vpop.f32.mrb[37].mxu0  ;;  %v996_v11 = vpop.f32.mrb[37].mxu1 }
 0x154   : > { %v869_v12 = vpop.f32.mrb[38].mxu0  ;;  %v997_v13 = vpop.f32.mrb[38].mxu1 }
 0x155   : > { %v1067_v14 = vmax.f32 %v867_v8, 0.0  ;;  %v1099_v16 = vmax.f32 %v995_v9, 0.0  ;;  %v870_v17 = vadd.f32 %v2282_v15, %v869_v12  ;;  %v998_v18 = vadd.f32 %v2282_v15, %v997_v13  ;;  %v871_v19 = vpop.f32.mrb[39].mxu0  ;;  %v999_v20 = vpop.f32.mrb[39].mxu1 }
 0x157   : > { %v1754_v21 = vpack.c.bf16 %v1067_v14, %v1067_v14  ;;  %v1786_v22 = vpack.c.bf16 %v1099_v16, %v1099_v16  ;;  %v1068_v23 = vmax.f32 %v870_v17, 0.0  ;;  %v1100_v24 = vmax.f32 %v998_v18, 0.0 }
 0x159   : > { %1388 = vst.msk [vmem:[%s2290_s11 + $0x48] sm:$0xf] %vm1369_vm3, %v1754_v21  ;;  %1420 = vst.msk [vmem:[%s2290_s11 + $0xc8] sm:$0xf] %vm1369_vm3, %v1786_v22  ;;  %v1755_v25 = vpack.c.bf16 %v1068_v23, %v1068_v23  ;;  %v1787_v26 = vpack.c.bf16 %v1100_v24, %v1100_v24 }
 0x15a   : > { %v874_v27 = vpop.f32.mrb[40].mxu0  ;;  %v1002_v28 = vpop.f32.mrb[40].mxu1 }
 0x15b   : > { %1389 = vst.msk [vmem:[%s2290_s11 + $0x4c] sm:$0xf] %vm1369_vm3, %v1755_v25  ;;  %1421 = vst.msk [vmem:[%s2290_s11 + $0xcc] sm:$0xf] %vm1369_vm3, %v1787_v26  ;;  %v875_v29 = vadd.f32 %v2282_v15, %v874_v27  ;;  %v1003_v30 = vadd.f32 %v2282_v15, %v1002_v28  ;;  %v876_v31 = vpop.f32.mrb[41].mxu0  ;;  %v1004_v32 = vpop.f32.mrb[41].mxu1 }
 0x15c   : > { %v877_v33 = vpop.f32.mrb[42].mxu0  ;;  %v1005_v34 = vpop.f32.mrb[42].mxu1 }
 0x15d   : > { %v1069_v35 = vmax.f32 %v875_v29, 0.0  ;;  %v1101_v36 = vmax.f32 %v1003_v30, 0.0  ;;  %v878_v37 = vadd.f32 %v2282_v15, %v877_v33  ;;  %v1006_v38 = vadd.f32 %v2282_v15, %v1005_v34  ;;  %v879_v39 = vpop.f32.mrb[43].mxu0  ;;  %v1007_v40 = vpop.f32.mrb[43].mxu1 }
 0x15f   : > { %v1756_v41 = vpack.c.bf16 %v1069_v35, %v1069_v35  ;;  %v1788_v42 = vpack.c.bf16 %v1101_v36, %v1101_v36  ;;  %v1070_v43 = vmax.f32 %v878_v37, 0.0  ;;  %v1102_v44 = vmax.f32 %v1006_v38, 0.0 }
 0x161   : > { %1390 = vst.msk [vmem:[%s2290_s11 + $0x50] sm:$0xf] %vm1369_vm3, %v1756_v41  ;;  %1422 = vst.msk [vmem:[%s2290_s11 + $0xd0] sm:$0xf] %vm1369_vm3, %v1788_v42  ;;  %v1757_v45 = vpack.c.bf16 %v1070_v43, %v1070_v43  ;;  %v1789_v46 = vpack.c.bf16 %v1102_v44, %v1102_v44 }
 0x162   : > { %v882_v47 = vpop.f32.mrb[44].mxu0  ;;  %v1010_v48 = vpop.f32.mrb[44].mxu1 }
 0x163   : > { %1391 = vst.msk [vmem:[%s2290_s11 + $0x54] sm:$0xf] %vm1369_vm3, %v1757_v45  ;;  %1423 = vst.msk [vmem:[%s2290_s11 + $0xd4] sm:$0xf] %vm1369_vm3, %v1789_v46  ;;  %v883_v49 = vadd.f32 %v2282_v15, %v882_v47  ;;  %v1011_v50 = vadd.f32 %v2282_v15, %v1010_v48  ;;  %v884_v51 = vpop.f32.mrb[45].mxu0  ;;  %v1012_v52 = vpop.f32.mrb[45].mxu1 }
 0x164   : > { %v885_v53 = vpop.f32.mrb[46].mxu0  ;;  %v1013_v54 = vpop.f32.mrb[46].mxu1 }
 0x165   : > { %v1071_v55 = vmax.f32 %v883_v49, 0.0  ;;  %v1103_v56 = vmax.f32 %v1011_v50, 0.0  ;;  %v886_v57 = vadd.f32 %v2282_v15, %v885_v53  ;;  %v1014_v58 = vadd.f32 %v2282_v15, %v1013_v54  ;;  %v887_v59 = vpop.f32.mrb[47].mxu0  ;;  %v1015_v60 = vpop.f32.mrb[47].mxu1 }
 0x167   : > { %v1758_v61 = vpack.c.bf16 %v1071_v55, %v1071_v55  ;;  %v1790_v62 = vpack.c.bf16 %v1103_v56, %v1103_v56  ;;  %v1072_v63 = vmax.f32 %v886_v57, 0.0  ;;  %v1104_v0 = vmax.f32 %v1014_v58, 0.0 }
 0x169   : > { %1392 = vst.msk [vmem:[%s2290_s11 + $0x58] sm:$0xf] %vm1369_vm3, %v1758_v61  ;;  %1424 = vst.msk [vmem:[%s2290_s11 + $0xd8] sm:$0xf] %vm1369_vm3, %v1790_v62  ;;  %v1759_v1 = vpack.c.bf16 %v1072_v63, %v1072_v63  ;;  %v1791_v2 = vpack.c.bf16 %v1104_v0, %v1104_v0 }
 0x16a   : > { %v890_v3 = vpop.f32.mrb[48].mxu0  ;;  %v1018_v4 = vpop.f32.mrb[48].mxu1 }
 0x16b   : > { %1393 = vst.msk [vmem:[%s2290_s11 + $0x5c] sm:$0xf] %vm1369_vm3, %v1759_v1  ;;  %1425 = vst.msk [vmem:[%s2290_s11 + $0xdc] sm:$0xf] %vm1369_vm3, %v1791_v2  ;;  %v891_v5 = vadd.f32 %v2282_v15, %v890_v3  ;;  %v1019_v6 = vadd.f32 %v2282_v15, %v1018_v4  ;;  %v892_v7 = vpop.f32.mrb[49].mxu0  ;;  %v1020_v8 = vpop.f32.mrb[49].mxu1 }
 0x16c   : > { %v893_v9 = vpop.f32.mrb[50].mxu0  ;;  %v1021_v10 = vpop.f32.mrb[50].mxu1 }
 0x16d   : > { %v1073_v11 = vmax.f32 %v891_v5, 0.0  ;;  %v1105_v12 = vmax.f32 %v1019_v6, 0.0  ;;  %v894_v13 = vadd.f32 %v2282_v15, %v893_v9  ;;  %v1022_v14 = vadd.f32 %v2282_v15, %v1021_v10  ;;  %v895_v16 = vpop.f32.mrb[51].mxu0  ;;  %v1023_v17 = vpop.f32.mrb[51].mxu1 }
 0x16f   : > { %v1760_v18 = vpack.c.bf16 %v1073_v11, %v1073_v11  ;;  %v1792_v19 = vpack.c.bf16 %v1105_v12, %v1105_v12  ;;  %v1074_v20 = vmax.f32 %v894_v13, 0.0  ;;  %v1106_v21 = vmax.f32 %v1022_v14, 0.0 }
 0x171   : > { %1394 = vst.msk [vmem:[%s2290_s11 + $0x60] sm:$0xf] %vm1369_vm3, %v1760_v18  ;;  %1426 = vst.msk [vmem:[%s2290_s11 + $0xe0] sm:$0xf] %vm1369_vm3, %v1792_v19  ;;  %v1761_v22 = vpack.c.bf16 %v1074_v20, %v1074_v20  ;;  %v1793_v23 = vpack.c.bf16 %v1106_v21, %v1106_v21 }
 0x172   : > { %v898_v24 = vpop.f32.mrb[52].mxu0  ;;  %v1026_v25 = vpop.f32.mrb[52].mxu1 }
 0x173   : > { %1395 = vst.msk [vmem:[%s2290_s11 + $0x64] sm:$0xf] %vm1369_vm3, %v1761_v22  ;;  %1427 = vst.msk [vmem:[%s2290_s11 + $0xe4] sm:$0xf] %vm1369_vm3, %v1793_v23  ;;  %v899_v26 = vadd.f32 %v2282_v15, %v898_v24  ;;  %v1027_v27 = vadd.f32 %v2282_v15, %v1026_v25  ;;  %v900_v28 = vpop.f32.mrb[53].mxu0  ;;  %v1028_v29 = vpop.f32.mrb[53].mxu1 }
 0x174   : > { %v901_v30 = vpop.f32.mrb[54].mxu0  ;;  %v1029_v31 = vpop.f32.mrb[54].mxu1 }
 0x175   : > { %v1075_v32 = vmax.f32 %v899_v26, 0.0  ;;  %v1107_v33 = vmax.f32 %v1027_v27, 0.0  ;;  %v902_v34 = vadd.f32 %v2282_v15, %v901_v30  ;;  %v1030_v35 = vadd.f32 %v2282_v15, %v1029_v31  ;;  %v903_v36 = vpop.f32.mrb[55].mxu0  ;;  %v1031_v37 = vpop.f32.mrb[55].mxu1 }
 0x177   : > { %v1762_v38 = vpack.c.bf16 %v1075_v32, %v1075_v32  ;;  %v1794_v39 = vpack.c.bf16 %v1107_v33, %v1107_v33  ;;  %v1076_v40 = vmax.f32 %v902_v34, 0.0  ;;  %v1108_v41 = vmax.f32 %v1030_v35, 0.0 }
 0x179   : > { %1396 = vst.msk [vmem:[%s2290_s11 + $0x68] sm:$0xf] %vm1369_vm3, %v1762_v38  ;;  %1428 = vst.msk [vmem:[%s2290_s11 + $0xe8] sm:$0xf] %vm1369_vm3, %v1794_v39  ;;  %v1763_v42 = vpack.c.bf16 %v1076_v40, %v1076_v40  ;;  %v1795_v43 = vpack.c.bf16 %v1108_v41, %v1108_v41 }
 0x17a   : > { %v906_v44 = vpop.f32.mrb[56].mxu0  ;;  %v1034_v45 = vpop.f32.mrb[56].mxu1 }
 0x17b   : > { %1397 = vst.msk [vmem:[%s2290_s11 + $0x6c] sm:$0xf] %vm1369_vm3, %v1763_v42  ;;  %1429 = vst.msk [vmem:[%s2290_s11 + $0xec] sm:$0xf] %vm1369_vm3, %v1795_v43  ;;  %v907_v46 = vadd.f32 %v2282_v15, %v906_v44  ;;  %v1035_v47 = vadd.f32 %v2282_v15, %v1034_v45  ;;  %v908_v48 = vpop.f32.mrb[57].mxu0  ;;  %v1036_v49 = vpop.f32.mrb[57].mxu1 }
 0x17c   : > { %v909_v50 = vpop.f32.mrb[58].mxu0  ;;  %v1037_v51 = vpop.f32.mrb[58].mxu1 }
 0x17d   : > { %v1077_v52 = vmax.f32 %v907_v46, 0.0  ;;  %v1109_v53 = vmax.f32 %v1035_v47, 0.0  ;;  %v910_v54 = vadd.f32 %v2282_v15, %v909_v50  ;;  %v1038_v55 = vadd.f32 %v2282_v15, %v1037_v51  ;;  %v911_v56 = vpop.f32.mrb[59].mxu0  ;;  %v1039_v57 = vpop.f32.mrb[59].mxu1 }
 0x17f   : > { %v1764_v58 = vpack.c.bf16 %v1077_v52, %v1077_v52  ;;  %v1796_v59 = vpack.c.bf16 %v1109_v53, %v1109_v53  ;;  %v1078_v60 = vmax.f32 %v910_v54, 0.0  ;;  %v1110_v61 = vmax.f32 %v1038_v55, 0.0 }
 0x181   : > { %1398 = vst.msk [vmem:[%s2290_s11 + $0x70] sm:$0xf] %vm1369_vm3, %v1764_v58  ;;  %1430 = vst.msk [vmem:[%s2290_s11 + $0xf0] sm:$0xf] %vm1369_vm3, %v1796_v59  ;;  %v1765_v62 = vpack.c.bf16 %v1078_v60, %v1078_v60  ;;  %v1797_v63 = vpack.c.bf16 %v1110_v61, %v1110_v61 }
 0x182   : > { %v914_v0 = vpop.f32.mrb[60].mxu0  ;;  %v1042_v1 = vpop.f32.mrb[60].mxu1 }
 0x183   : > { %1399 = vst.msk [vmem:[%s2290_s11 + $0x74] sm:$0xf] %vm1369_vm3, %v1765_v62  ;;  %1431 = vst.msk [vmem:[%s2290_s11 + $0xf4] sm:$0xf] %vm1369_vm3, %v1797_v63  ;;  %v915_v2 = vadd.f32 %v2282_v15, %v914_v0  ;;  %v1043_v3 = vadd.f32 %v2282_v15, %v1042_v1  ;;  %v916_v4 = vpop.f32.mrb[61].mxu0  ;;  %v1044_v5 = vpop.f32.mrb[61].mxu1 }
 0x184   : > { %v917_v6 = vpop.f32.mrb[62].mxu0  ;;  %v1045_v7 = vpop.f32.mrb[62].mxu1 }
 0x185   : > { %v1079_v8 = vmax.f32 %v915_v2, 0.0  ;;  %v1111_v9 = vmax.f32 %v1043_v3, 0.0  ;;  %v918_v10 = vadd.f32 %v2282_v15, %v917_v6  ;;  %v1046_v11 = vadd.f32 %v2282_v15, %v1045_v7  ;;  %v919_v12 = vpop.f32.mrb[63].mxu0  ;;  %v1047_v13 = vpop.f32.mrb[63].mxu1 }
 0x187   : > { %v1766_v14 = vpack.c.bf16 %v1079_v8, %v1079_v8  ;;  %v1798_v16 = vpack.c.bf16 %v1111_v9, %v1111_v9  ;;  %v1080_v17 = vmax.f32 %v918_v10, 0.0  ;;  %v1112_v18 = vmax.f32 %v1046_v11, 0.0 }
 0x189   : > { %1400 = vst.msk [vmem:[%s2290_s11 + $0x78] sm:$0xf] %vm1369_vm3, %v1766_v14  ;;  %1432 = vst.msk [vmem:[%s2290_s11 + $0xf8] sm:$0xf] %vm1369_vm3, %v1798_v16  ;;  %v1767_v15 = vpack.c.bf16 %v1080_v17, %v1080_v17  ;;  %v1799_v19 = vpack.c.bf16 %v1112_v18, %v1112_v18 }
 0x18b   : > { %1401 = vst.msk [vmem:[%s2290_s11 + $0x7c] sm:$0xf] %vm1369_vm3, %v1767_v15  ;;  %1433 = vst.msk [vmem:[%s2290_s11 + $0xfc] sm:$0xf] %vm1369_vm3, %v1799_v19 }
 0x18c   : > { %1999 = shalt.err (!%p1996_p5)
}
 0x18d   : > { %s2000_s4 = scalar_lea.hbm %s2477_s26, 4096  ;;  %s2004_s7 = scalar_lea.hbm %s2540_s3, 16384 }
 0x18e   : > { %p2001_p6 = scmp.ne.s32.totalorder %s2477_s26, %s2000_s4  ;;  %p2005_p10 = scmp.lt.u32.totalorder %s2477_s26, %s2540_s3 }
 0x18f   : > { %p2006_p11 = scmp.lt.u32.totalorder %s2004_s7, %s2000_s4  ;;  %p2008_p13 = scmp.lt.u32.totalorder %s2000_s4, %s2477_s26 }
 0x190   : > { %p2002_p7 = pnand %p2001_p6, %p2131_p4 }
 0x191   : > { %p2007_p12 = por %p2006_p11, %p2005_p10 }
 0x192   : > { %p2003_p9 = pneg %p2002_p7 }
 0x193   : > { %p2009_p0 = por %p2008_p13, %p2007_p12 }
 0x195   : > { %p2010_p1 = pnand %p2009_p0, %p2003_p9 }
 0x197   : > { %2013 = shalt.err (!%p2010_p1)
}
 0x198   : > { %s2069_s10 = smov 64   ;;  %s2070_s11 = smov 4  }
 0x199   : > { %1821 = dma.vmem_to_hbm [thread:$0]  (%p2131_p4), %s2479_s19, 4096, %s2477_s26, %s2491_s15, %s2069_s10, %s2069_s10, %s2070_s11  }
 0x19a PF: > { %p1827_p2 = scmp.ge.s32.totalorder %s2064_s17, 2  ;;  %s1464_s18 = sand.u32 1, %s2044_s12  }
 0x19b   : > { %s1465_s21 = scalar_lea.sflag [#allocation3], %s1464_s18 }
 0x19c   : > { %p1824_p3 = pnand %p1827_p2, %p2138_p8 }
 0x19e   : > { %2039 = dma.done.wait (!%p1824_p3), %s1465_s21, 4096  }
 0x19f   : > { %2041 = vsyncadd (!%p1824_p3), %s1465_s21, 4294963200  ;;  %s16_s17 = sadd.s32 1, %s2064_s17   ;;  %s2543_s12 = smov %s2048_s13 }
 0x1a0   : > { %p13_p5 = scmp.ge.s32.totalorder %s16_s17, 6   ;;  %s2544_s13 = smov %s2052_s14 }
 0x1a1   : > { %s2545_s14 = smov %s2144_s25  ;;  %s2546_s15 = smov %s2060_s16 }
 0x1a2   : > { %s2547_s16 = smov %s2549_s20  ;;  %15 = sbr.rel (!%p13_p5) target bundleno = 4 (0x4), region = 73 }
 0x1a9   :  { %1470 = vsyncpa [#allocation3], 1 }
 0x1aa   :  { %1472 = vsyncpa [#allocation3 + $0x1], 1 }

</bundles_post_ra>
